<compile_context>
chip_gen: v6e
topology: v6e:2x2x1
jax: 0.10.0
libtpu: 0.0.40
codegen_flags: <defaults>
</compile_context>

<pallas_src>
import functools

import jax
import jax.numpy as jnp
from jax.experimental import pallas as pl
from jax.experimental.pallas import tpu as pltpu

_HALF_BIN = 0.5 / 255.0
_LANES = 128
# Aligned path: up to 4096 rows x 128 lanes (f32: 2 MiB x-block + 4 MiB
# p-block + 2 MiB out-block -> 16 MiB double-buffered).
_MAX_BLOCK_ROWS = 4096
# Ragged path: up to 512*128 lanes per (1, K)/(2, K) block.
_MAX_BLOCK_LANES = 512 * _LANES
_VMEM_LIMIT_BYTES = 32 * 1024 * 1024


def _logistic_bin_prob_kernel(x_ref, p_ref, out_ref):
    """Logistic bin probability on one tile.

    Aligned path: x_ref (br, 128), p_ref (2, br, 128), out_ref (br, 128).
    Ragged  path: x_ref (1, K),    p_ref (2, K),       out_ref (1, K).
    """
    x = x_ref[...].astype(jnp.float32)
    if len(p_ref.shape) == 3:            # aligned: p carries (2, br, 128)
        mean = p_ref[0].astype(jnp.float32)
        raw = p_ref[1].astype(jnp.float32)
    else:                                # ragged: p is (2, K)
        mean = p_ref[0:1, :].astype(jnp.float32)
        raw = p_ref[1:2, :].astype(jnp.float32)
    s = jnp.abs(raw)
    s = jnp.where(s == 0.0, jnp.float32(1e-6), s)
    # sigmoid(a) - sigmoid(b) == 0.5*(tanh(a/2) - tanh(b/2)); with
    # half_inv = 0.5*exp(-s) this is 3 EUP pushes/element and zero divides.
    half_inv = 0.5 * jnp.exp(-s)
    d = x - mean
    hi = jnp.tanh((d + _HALF_BIN) * half_inv)
    lo = jnp.tanh((d - _HALF_BIN) * half_inv)
    out_ref[...] = (0.5 * (hi - lo)).astype(out_ref.dtype)


def _sublane_tile(*dtypes):
    """Native sublane tile: 8 for 4-byte, 16 for 2-byte, 32 for 1-byte dtypes."""
    tile = 8
    for dt in dtypes:
        isz = jnp.dtype(dt).itemsize
        if isz < 4:
            tile = max(tile, 8 * (4 // isz))
    return tile


def _pick_block(extent, unit, max_block, n_batch):
    """Block size along one axis: as large as possible (amortize the ~0.35us
    per-step overhead) while giving >= ~8 total parallel grid steps so both
    v7x TensorCores get >= 2 pipelined steps each.  Result is either a
    multiple of `unit` or the full extent (both legal tilings)."""
    if extent <= unit:
        return extent
    target_steps = max(-(-8 // max(n_batch, 1)),      # >= ~8 steps overall
                       -(-extent // max_block))        # never exceed max_block
    blk = -(-extent // target_steps)
    blk = -(-blk // unit) * unit                       # round up to tile unit
    blk = min(blk, max_block)
    return extent if blk >= extent else blk


@functools.partial(jax.jit, static_argnames=("distribution_type", "mixture"))
def distribution_for_entropy2(x, p_dec, distribution_type="logistic",
                              mixture=False):
    """JAX/Pallas port of Distribution_for_entropy2.forward (non-mixture)."""
    if mixture:
        # TODO(synk): mixture branch depends on an undefined global `args`
        # (args.n_mixtures) in the original source and cannot run as written.
        raise NotImplementedError("mixture=True path not implemented")
    if distribution_type != "logistic":
        # TODO(synk): laplace/normal CDF branches (erf / expm1) not ported.
        raise NotImplementedError("only the default 'logistic' path is ported")

    n, c, h, w = p_dec.shape
    assert c == 2, "torch.chunk unpack into (mean, scales) needs C==2"
    assert x.shape == (n, 1, h, w)

    hw = h * w
    out_dtype = jnp.result_type(x.dtype, p_dec.dtype)
    sub = _sublane_tile(x.dtype, p_dec.dtype, out_dtype)

    x_isz = jnp.dtype(x.dtype).itemsize
    p_isz = jnp.dtype(p_dec.dtype).itemsize
    o_isz = jnp.dtype(out_dtype).itemsize
    cost = pl.CostEstimate(
        flops=12 * n * hw,
        transcendentals=3 * n * hw,
        bytes_accessed=n * hw * (x_isz + 2 * p_isz + o_isz))
    cparams = pltpu.CompilerParams(
        dimension_semantics=("parallel", "parallel"),
        vmem_limit_bytes=_VMEM_LIMIT_BYTES)

    if hw % _LANES == 0:
        # Fast path: free view to (rows, 128), dense vreg utilization.
        rows = hw // _LANES
        x_view = x.reshape(n, rows, _LANES)
        p_view = p_dec.reshape(n, 2, rows, _LANES)
        br = _pick_block(rows, sub, _MAX_BLOCK_ROWS, n)
        grid = (n, pl.cdiv(rows, br))
        out = pl.pallas_call(
            _logistic_bin_prob_kernel,
            out_shape=jax.ShapeDtypeStruct((n, rows, _LANES), out_dtype),
            grid=grid,
            in_specs=[
                pl.BlockSpec((None, br, _LANES), lambda i, j: (i, j, 0)),
                pl.BlockSpec((None, 2, br, _LANES), lambda i, j: (i, 0, j, 0)),
            ],
            out_specs=pl.BlockSpec((None, br, _LANES), lambda i, j: (i, j, 0)),
            compiler_params=cparams,
            cost_estimate=cost,
        )(x_view, p_view)
        return out.reshape(n, 1, h, w)

    # Ragged path (hw % 128 != 0): no jnp.pad / output slice.  Free views to
    # (n,1,hw)/(n,2,hw); lane-blocked specs; Pallas masks the partial
    # boundary block along the lane axis.
    x_view = x.reshape(n, 1, hw)
    p_view = p_dec.reshape(n, 2, hw)
    bl = _pick_block(hw, _LANES, _MAX_BLOCK_LANES, n)
    grid = (n, pl.cdiv(hw, bl))
    out = pl.pallas_call(
        _logistic_bin_prob_kernel,
        out_shape=jax.ShapeDtypeStruct((n, 1, hw), out_dtype),
        grid=grid,
        in_specs=[
            pl.BlockSpec((None, 1, bl), lambda i, j: (i, 0, j)),
            pl.BlockSpec((None, 2, bl), lambda i, j: (i, 0, j)),
        ],
        out_specs=pl.BlockSpec((None, 1, bl), lambda i, j: (i, 0, j)),
        compiler_params=cparams,
        cost_estimate=cost,
    )(x_view, p_view)
    return out.reshape(n, 1, h, w)


def _reference(x, p_dec):
    """Pure-jnp reference of the torch forward (logistic, non-mixture)."""
    xf = x.astype(jnp.float32)
    mean = p_dec[:, 0:1, :, :].astype(jnp.float32)
    s = jnp.abs(p_dec[:, 1:2, :, :].astype(jnp.float32))
    s = jnp.where(s == 0.0, 1e-6, s)
    es = jnp.exp(s)
    out = (jax.nn.sigmoid((xf + _HALF_BIN - mean) / es)
           - jax.nn.sigmoid((xf - _HALF_BIN - mean) / es))
    return out.astype(jnp.result_type(x.dtype, p_dec.dtype))


if __name__ == "__main__":
    key = jax.random.PRNGKey(0)
    kx, kp, kx2, kp2 = jax.random.split(key, 4)

    # Case 1: lane-aligned spatial size (dense (rows, 128) fast path).
    N, H, W = 2, 16, 16
    x = jax.random.uniform(kx, (N, 1, H, W), jnp.float32, minval=-1.0, maxval=1.0)
    p_dec = jax.random.normal(kp, (N, 2, H, W), jnp.float32) * 0.5
    p_dec = p_dec.at[0, 1, 0, :4].set(0.0)   # exercise scales==0 -> 1e-6 branch

    out = jax.block_until_ready(distribution_for_entropy2(x, p_dec))
    ref = _reference(x, p_dec)
    assert out.shape == (N, 1, H, W)
    assert jnp.allclose(out, ref, atol=1e-6, rtol=1e-5), (
        f"max abs err {jnp.max(jnp.abs(out - ref))}")

    # Case 2: ragged spatial size (pad-free lane-blocked path, boundary mask).
    N2, H2, W2 = 2, 10, 13
    x2 = jax.random.uniform(kx2, (N2, 1, H2, W2), jnp.float32, minval=-1.0, maxval=1.0)
    p2 = jax.random.normal(kp2, (N2, 2, H2, W2), jnp.float32) * 0.5

    out2 = jax.block_until_ready(distribution_for_entropy2(x2, p2))
    ref2 = _reference(x2, p2)
    assert out2.shape == (N2, 1, H2, W2)
    assert jnp.allclose(out2, ref2, atol=1e-6, rtol=1e-5), (
        f"max abs err {jnp.max(jnp.abs(out2 - ref2))}")

    print("KERNEL_OK")
</pallas_src>

<mosaic_0001>
module attributes {stable_mosaic.version = 11 : i64} {
  func.func @_logistic_bin_prob_kernel(%arg0: i32, %arg1: i32, %arg2: memref<1x2x128xf32, #tpu.memory_space<vmem>>, %arg3: memref<1x2x2x128xf32, #tpu.memory_space<vmem>>, %arg4: memref<1x2x128xf32, #tpu.memory_space<vmem>>) attributes {dimension_semantics = [#tpu.dimension_semantics<parallel>, #tpu.dimension_semantics<parallel>], iteration_bounds = array<i64: 2, 1>, scalar_prefetch = 0 : i64, scratch_operands = 0 : i64, tpu.core_type = #tpu.core_type<tc>, window_params = [{transform_indices = @transform_0, window_bounds = array<i64: 1, 2, 128>}, {transform_indices = @transform_1, window_bounds = array<i64: 1, 2, 2, 128>}, {transform_indices = @transform_2, window_bounds = array<i64: 1, 2, 128>}]} {
    %c0 = arith.constant 0 : index
    %c0_0 = arith.constant 0 : index
    %c0_1 = arith.constant 0 : index
    %0 = vector.load %arg2[%c0, %c0_0, %c0_1] : memref<1x2x128xf32, #tpu.memory_space<vmem>>, vector<1x2x128xf32>
    %1 = vector.shape_cast %0 : vector<1x2x128xf32> to vector<2x128xf32>
    %c0_2 = arith.constant 0 : index
    %c0_3 = arith.constant 0 : index
    %c0_4 = arith.constant 0 : index
    %c0_5 = arith.constant 0 : index
    %2 = vector.load %arg3[%c0_2, %c0_3, %c0_4, %c0_5] : memref<1x2x2x128xf32, #tpu.memory_space<vmem>>, vector<1x1x2x128xf32>
    %3 = vector.shape_cast %2 : vector<1x1x2x128xf32> to vector<2x128xf32>
    %c0_6 = arith.constant 0 : index
    %c1 = arith.constant 1 : index
    %c0_7 = arith.constant 0 : index
    %c0_8 = arith.constant 0 : index
    %4 = vector.load %arg3[%c0_6, %c1, %c0_7, %c0_8] : memref<1x2x2x128xf32, #tpu.memory_space<vmem>>, vector<1x1x2x128xf32>
    %5 = vector.shape_cast %4 : vector<1x1x2x128xf32> to vector<2x128xf32>
    %6 = math.absf %5 : vector<2x128xf32>
    %cst = arith.constant 0.000000e+00 : f32
    %7 = vector.broadcast %cst : f32 to vector<2x128xf32>
    %8 = arith.cmpf oeq, %6, %7 : vector<2x128xf32>
    %cst_9 = arith.constant 9.99999997E-7 : f32
    %9 = vector.broadcast %cst_9 : f32 to vector<2x128xf32>
    %10 = arith.select %8, %9, %6 : vector<2x128xi1>, vector<2x128xf32>
    %cst_10 = arith.constant 0.000000e+00 : f32
    %11 = vector.broadcast %cst_10 : f32 to vector<2x128xf32>
    %12 = arith.subf %11, %10 : vector<2x128xf32>
    %13 = math.exp %12 : vector<2x128xf32>
    %cst_11 = arith.constant 5.000000e-01 : f32
    %14 = vector.broadcast %cst_11 : f32 to vector<2x128xf32>
    %15 = arith.mulf %14, %13 : vector<2x128xf32>
    %16 = arith.subf %1, %3 : vector<2x128xf32>
    %cst_12 = arith.constant 0.00196078443 : f32
    %17 = vector.broadcast %cst_12 : f32 to vector<2x128xf32>
    %18 = arith.addf %16, %17 : vector<2x128xf32>
    %19 = arith.mulf %18, %15 : vector<2x128xf32>
    %20 = math.tanh %19 : vector<2x128xf32>
    %cst_13 = arith.constant 0.00196078443 : f32
    %21 = vector.broadcast %cst_13 : f32 to vector<2x128xf32>
    %22 = arith.subf %16, %21 : vector<2x128xf32>
    %23 = arith.mulf %22, %15 : vector<2x128xf32>
    %24 = math.tanh %23 : vector<2x128xf32>
    %25 = arith.subf %20, %24 : vector<2x128xf32>
    %cst_14 = arith.constant 5.000000e-01 : f32
    %26 = vector.broadcast %cst_14 : f32 to vector<2x128xf32>
    %27 = arith.mulf %26, %25 : vector<2x128xf32>
    %c0_15 = arith.constant 0 : index
    %c0_16 = arith.constant 0 : index
    %c0_17 = arith.constant 0 : index
    %28 = vector.load %arg4[%c0_15, %c0_16, %c0_17] : memref<1x2x128xf32, #tpu.memory_space<vmem>>, vector<1x2x128xf32>
    %29 = vector.shape_cast %28 : vector<1x2x128xf32> to vector<2x128xf32>
    %30 = vector.shape_cast %27 : vector<2x128xf32> to vector<1x2x128xf32>
    tpu.vector_store %arg4[%c0_15, %c0_16, %c0_17], %30 {strides = array<i32>} : memref<1x2x128xf32, #tpu.memory_space<vmem>>, vector<1x2x128xf32>,
    return
  }
  func.func @transform_0(%arg0: i32, %arg1: i32) -> (i32, i32, i32) {
    %c0_i32 = arith.constant 0 : i32
    %c0_i32_0 = arith.constant 0 : i32
    return %arg0, %arg1, %c0_i32 : i32, i32, i32
  }
  func.func @transform_1(%arg0: i32, %arg1: i32) -> (i32, i32, i32, i32) {
    %c0_i32 = arith.constant 0 : i32
    %c0_i32_0 = arith.constant 0 : i32
    %c0_i32_1 = arith.constant 0 : i32
    return %arg0, %c0_i32, %arg1, %c0_i32_0 : i32, i32, i32, i32
  }
  func.func @transform_2(%arg0: i32, %arg1: i32) -> (i32, i32, i32) {
    %c0_i32 = arith.constant 0 : i32
    %c0_i32_0 = arith.constant 0 : i32
    return %arg0, %arg1, %c0_i32 : i32, i32, i32
  }
}

</mosaic_0001>

<bundles_post_ra>
// kernel: distribution_for_entropy2.1
= control target key start
LH: loop header
LB: loop body
LE: loop exit
PB: predicated region body
PF: predicated region fallthrough
CT: control target
= control target key end

     0   :  { %s397_s9 = smov 0   ;;  %s399_s10 = smov 0   ;;  %s433_s0 = inlined_call_operand.vmem [shape: f32[2,2,128], index: 0, kind: input, shape index: {}]   ;;  %s434_s1 = inlined_call_operand.vmem [shape: f32[2,2,2,128], index: 1, kind: input, shape index: {}]   ;;  %s435_s2 = inlined_call_operand.vmem [shape: f32[2,2,128], index: 2, kind: output, shape index: {}]  }
   0x1   :  { %s401_s11 = smov 0  }
   0x2 LB: > { %s24_s12 = sadd.s32 1, %s376_s10  ;;  %p318_p0 = scmp.ge.s32.totalorder %s380_s11, 1  ;;  %s380_s11 = sphi %s401_s11, %s12_s11   ;;  %s376_s10 = sphi %s399_s10, %s437_s10   ;;  %s372_s9 = sphi %s397_s9, %s436_s9  }
   0x3   : > { %p26_p1 = scmp.ge.s32.totalorder %s24_s12, 2  ;;  %p145_p2 = scmp.lt.s32.totalorder %s380_s11, 3 }
   0x5   : > { %s439_s12 = smov (%p26_p1, %s24_s12), 0  ;;  %p146_p3 = pnand %p318_p0, %p145_p2 }
   0x6   : > { %p179_p4 = scmp.lt.s32.totalorder (!%p146_p3), %s372_s9, 1 }
   0x7   : > { %149 = sbr.rel (%p146_p3) target bundleno = 62 (0x3e), region = 28 }
   0xc   : > { %s441_s9 = smov (!%p179_p4, %s372_s9), 1 }
   0xd   : > { %s327_s13 = sshll.u32 %s441_s9, 2  ;;  %s319_s17 = sshll.u32 %s441_s9, 1 }
   0xe   : > { %s193_s16 = scalar_lea.vmem %s434_s1, %s327_s13  ;;  %s185_s20 = scalar_lea.vmem %s433_s0, %s319_s17 }
   0xf   : > { %v323_v0 = vld [vmem:[%s193_s16 + $0x2] sm:$0x3]  ;;  %v201_v5 = vld [vmem:[%s185_s20] sm:$0x3]  ;;  %s200_s23 = scalar_lea.vmem %s435_s2, %s319_s17 }
  0x10   : > { %v205_v1 = vand.u32 2147483647, %v323_v0  ;;  %v202_v6 = vld [vmem:[%s193_s16] sm:$0x3] }
  0x11   : > { %v212_v7 = vsub.f32 %v201_v5, %v202_v6 }
  0x12   : > { %vm206_vm0 = vcmp.eq.f32.partialorder %v205_v1, 0.0 }
  0x13   : > { %v207_v2 = vsel %vm206_vm0, 1e-06, %v205_v1  ;;  %v213_v8 = vadd.f32 0.0019607844, %v212_v7  ;;  %v324_v9 = vadd.f32 -0.0019607844, %v212_v7 }
  0x14   : > { %v208_v3 = vsub.f32 0.0, %v207_v2 }
  0x16   : > { %v209_v4 = vmul.f32 1.442695, %v208_v3 }
  0x18   : > { %352 = vpow2.f32 %v209_v4 }
  0x25   : > { %v353_v10 = vpop.eup %352 }
  0x26   : > { %v211_v11 = vmul.f32 0.5, %v353_v10 }
  0x28   : > { %v214_v12 = vmul.f32 %v213_v8, %v211_v11  ;;  %v217_v13 = vmul.f32 %v324_v9, %v211_v11 }
  0x2a   : > { %354 = vtanh.f32 %v214_v12 }
  0x2b   : > { %356 = vtanh.f32 %v217_v13 }
  0x37   : > { %v355_v14 = vpop.eup %354 }
  0x38   : > { %v357_v15 = vpop.eup %356 }
  0x39   : > { %v219_v16 = vsub.f32 %v355_v14, %v357_v15 }
  0x3b   : > { %v220_v17 = vmul.f32 0.5, %v219_v16 }
  0x3d   : > { %221 = vst [vmem:[%s200_s23] sm:$0x3] %v220_v17 }
  0x3e PF: > { %s12_s11 = sadd.s32 1, %s380_s11   ;;  %s436_s9 = smov %s376_s10 }
  0x3f   : > { %p9_p5 = scmp.ge.s32.totalorder %s12_s11, 4   ;;  %s437_s10 = smov %s439_s12 }
  0x41   :  { %11 = sbr.rel (!%p9_p5) target bundleno = 2 (0x2), region = 62 }

</bundles_post_ra>
